<compile_context>
chip_gen: v7x
topology: tpu7x:2x2x1
jax: 0.10.0
libtpu: 0.0.40
codegen_flags: <defaults>
</compile_context>

<pallas_src>
import functools

import jax
import jax.numpy as jnp
from jax.experimental import pallas as pl
from jax.experimental.pallas import tpu as pltpu

LANE = 128


def _round_up(x: int, m: int) -> int:
    return ((x + m - 1) // m) * m


def softmax_model_kernel(x_ref, w1_ref, b1_ref, w2_ref, b2_ref, o_ref, *, num_out):
    # Linear 1: cast x to bf16 in-kernel, (tb, num_in) @ (num_in, hid_p) -> f32 acc.
    x = x_ref[...].astype(jnp.bfloat16)
    h = jnp.dot(x, w1_ref[...], preferred_element_type=jnp.float32)
    h = h + b1_ref[...]

    # Sigmoid in f32; divide -> EUP approx reciprocal (exp already on EUP).
    h = pl.reciprocal(1.0 + jnp.exp(-h), approx=True)

    # Linear 2: bf16 MXU feed, f32 accumulate.  Padded b2 columns are -1e30, so the
    # padded logits contribute exactly 0 to the softmax (f32 exp underflows to 0).
    logits = jnp.dot(h.astype(jnp.bfloat16), w2_ref[...],
                     preferred_element_type=jnp.float32)
    logits = logits + b2_ref[...]

    # Numerically-stable softmax over dim=1 with an exact final divide.
    m = jnp.max(logits, axis=1, keepdims=True)
    e = jnp.exp(logits - m)
    s = jnp.sum(e, axis=1, keepdims=True)
    probs = e / s

    # Store only the valid (un-padded) output columns.
    o_ref[...] = probs[:, :num_out]


def prepare_softmax_model_params(w1_t, b1, w2_t, b2):
    """One-time (per model) padding + bf16 casts of the resident weights/biases.

    w1_t: (num_in, hidden), b1: (hidden,) or (1, hidden),
    w2_t: (hidden, num_out), b2: (num_out,) or (1, num_out).
    """
    num_in, hidden = w1_t.shape
    num_out = w2_t.shape[1]
    hid_p = _round_up(hidden, LANE)
    out_p = _round_up(num_out, LANE)

    f32, bf16 = jnp.float32, jnp.bfloat16

    w1_p = jnp.zeros((num_in, hid_p), bf16).at[:, :hidden].set(w1_t.astype(bf16))
    b1_p = jnp.zeros((1, hid_p), f32).at[:, :hidden].set(
        b1.astype(f32).reshape(1, -1))
    w2_p = jnp.zeros((hid_p, out_p), bf16).at[:hidden, :num_out].set(w2_t.astype(bf16))
    # Dead output columns get -1e30 (f32-safe: exp underflows to 0; never cast to bf16).
    b2_p = jnp.full((1, out_p), -1e30, f32).at[:, :num_out].set(
        b2.astype(f32).reshape(1, -1))
    return w1_p, b1_p, w2_p, b2_p, int(num_out)


@functools.partial(jax.jit, static_argnames=("num_out", "tile_b"))
def softmax_model_forward(x, w1_p, b1_p, w2_p, b2_p, *, num_out, tile_b=2048):
    """x: (B, num_in) f32; padded params from prepare_softmax_model_params.
    Returns (B, num_out) f32 softmax probabilities."""
    B, num_in = x.shape
    hid_p = w1_p.shape[1]
    out_p = w2_p.shape[1]

    # Batch tile: multiple of 8 sublanes, large enough to amortize per-step overhead,
    # capped so the parallel axis has >= 2 tiles when B is big (v7x megacore).
    tb = min(tile_b, _round_up(B, 8))
    if B > 16:
        tb = min(tb, _round_up(-(-B // 2), 8))
    tb = max(tb, 8)
    b_p = _round_up(B, tb)

    # Only pad the batch dim, and only when needed (no feature-dim pad, no host cast).
    x_in = x if b_p == B else jnp.zeros((b_p, num_in), x.dtype).at[:B].set(x)

    grid = (b_p // tb,)

    out = pl.pallas_call(
        functools.partial(softmax_model_kernel, num_out=num_out),
        out_shape=jax.ShapeDtypeStruct((b_p, num_out), jnp.float32),
        grid_spec=pltpu.PrefetchScalarGridSpec(
            num_scalar_prefetch=0,
            grid=grid,
            in_specs=[
                pl.BlockSpec((tb, num_in), lambda i: (i, 0)),     # x: tiled over batch
                pl.BlockSpec((num_in, hid_p), lambda i: (0, 0)),  # W1^T: resident
                pl.BlockSpec((1, hid_p), lambda i: (0, 0)),       # b1: resident
                pl.BlockSpec((hid_p, out_p), lambda i: (0, 0)),   # W2^T: resident
                pl.BlockSpec((1, out_p), lambda i: (0, 0)),       # b2: resident
            ],
            out_specs=pl.BlockSpec((tb, num_out), lambda i: (i, 0)),
        ),
        compiler_params=pltpu.CompilerParams(
            dimension_semantics=("parallel",),
        ),
    )(x_in, w1_p, b1_p, w2_p, b2_p)

    return out if b_p == B else out[:B]


if __name__ == "__main__":
    # Shapes implied by the module: num_in, hidden = num_in * params_mul, num_out.
    batch = 8
    num_in = 32
    params_mul = 4
    hidden = num_in * params_mul   # 128
    num_out = 8

    key = jax.random.PRNGKey(0)
    kx, k1, kb1, k2, kb2 = jax.random.split(key, 5)

    x = jax.random.normal(kx, (batch, num_in), dtype=jnp.float32)

    # PyTorch Linear stores weight as (out, in); we keep it pre-transposed (in, out).
    bound1 = 1.0 / jnp.sqrt(num_in)
    w1_t = jax.random.uniform(k1, (num_in, hidden), minval=-bound1, maxval=bound1,
                              dtype=jnp.float32)
    b1 = jax.random.uniform(kb1, (1, hidden), minval=-bound1, maxval=bound1,
                            dtype=jnp.float32)

    bound2 = 1.0 / jnp.sqrt(hidden)
    w2_t = jax.random.uniform(k2, (hidden, num_out), minval=-bound2, maxval=bound2,
                              dtype=jnp.float32)
    b2 = jax.random.uniform(kb2, (1, num_out), minval=-bound2, maxval=bound2,
                            dtype=jnp.float32)

    # One-time parameter prep (hoisted out of the per-call forward).
    w1_p, b1_p, w2_p, b2_p, n_out = prepare_softmax_model_params(w1_t, b1, w2_t, b2)

    out = softmax_model_forward(x, w1_p, b1_p, w2_p, b2_p, num_out=n_out)
    out = jax.block_until_ready(out)

    # Pure-JAX f32 reference (kernel uses bf16 matmul operands + approx sigmoid
    # reciprocal -> ~1e-2 relative error, covered by the tolerance below).
    ref = jax.nn.softmax(jax.nn.sigmoid(x @ w1_t + b1) @ w2_t + b2, axis=1)
    assert out.shape == (batch, num_out)
    assert jnp.allclose(out, ref, atol=2e-2, rtol=2e-2)
    # Exact f32 divide for normalization -> rows sum to 1 to f32 roundoff.
    assert jnp.allclose(jnp.sum(out, axis=1), 1.0, atol=1e-5)

    print("KERNEL_OK")
</pallas_src>

<mosaic_0001>
module attributes {stable_mosaic.version = 11 : i64} {
  func.func @softmax_model_kernel(%arg0: i32, %arg1: memref<8x32xf32, #tpu.memory_space<vmem>>, %arg2: memref<32x128xbf16, #tpu.memory_space<vmem>>, %arg3: memref<1x128xf32, #tpu.memory_space<vmem>>, %arg4: memref<128x128xbf16, #tpu.memory_space<vmem>>, %arg5: memref<1x128xf32, #tpu.memory_space<vmem>>, %arg6: memref<8x8xf32, #tpu.memory_space<vmem>>) attributes {dimension_semantics = [#tpu.dimension_semantics<parallel>], iteration_bounds = array<i64: 1>, scalar_prefetch = 0 : i64, scratch_operands = 0 : i64, tpu.core_type = #tpu.core_type<tc>, window_params = [{transform_indices = @transform_0, window_bounds = array<i64: 8, 32>}, {pipeline_mode = #tpu.pipeline_mode<synchronous>, transform_indices = @transform_1, window_bounds = array<i64: 32, 128>}, {pipeline_mode = #tpu.pipeline_mode<synchronous>, transform_indices = @transform_2, window_bounds = array<i64: 1, 128>}, {pipeline_mode = #tpu.pipeline_mode<synchronous>, transform_indices = @transform_3, window_bounds = array<i64: 128, 128>}, {pipeline_mode = #tpu.pipeline_mode<synchronous>, transform_indices = @transform_4, window_bounds = array<i64: 1, 128>}, {transform_indices = @transform_5, window_bounds = array<i64: 8, 8>}]} {
    %c0 = arith.constant 0 : index
    %c0_0 = arith.constant 0 : index
    %0 = vector.load %arg1[%c0, %c0_0] : memref<8x32xf32, #tpu.memory_space<vmem>>, vector<8x32xf32>
    %1 = arith.truncf %0 : vector<8x32xf32> to vector<8x32xbf16>
    %c0_1 = arith.constant 0 : index
    %c0_2 = arith.constant 0 : index
    %2 = vector.load %arg2[%c0_1, %c0_2] : memref<32x128xbf16, #tpu.memory_space<vmem>>, vector<32x128xbf16>
    %cst = arith.constant dense<0.000000e+00> : vector<8x128xf32>
    %3 = tpu.matmul %1, %2, %cst {dimension_numbers = #tpu.dot_dimension_numbers<[1], [0], [0], [1], [0, 0, 1, 1], [], []>} : vector<8x32xbf16>, vector<32x128xbf16>, vector<8x128xf32> -> vector<8x128xf32>
    %c0_3 = arith.constant 0 : index
    %c0_4 = arith.constant 0 : index
    %4 = vector.load %arg3[%c0_3, %c0_4] : memref<1x128xf32, #tpu.memory_space<vmem>>, vector<1x128xf32>
    %5 = vector.broadcast %4 : vector<1x128xf32> to vector<8x128xf32>
    %6 = arith.addf %3, %5 : vector<8x128xf32>
    %cst_5 = arith.constant 0.000000e+00 : f32
    %7 = vector.broadcast %cst_5 : f32 to vector<8x128xf32>
    %8 = arith.subf %7, %6 : vector<8x128xf32>
    %9 = math.exp %8 : vector<8x128xf32>
    %cst_6 = arith.constant 1.000000e+00 : f32
    %10 = vector.broadcast %cst_6 : f32 to vector<8x128xf32>
    %11 = arith.addf %10, %9 : vector<8x128xf32>
    %12 = tpu.reciprocal %11 {approx = true} : vector<8x128xf32> -> vector<8x128xf32>
    %13 = arith.truncf %12 : vector<8x128xf32> to vector<8x128xbf16>
    %c0_7 = arith.constant 0 : index
    %c0_8 = arith.constant 0 : index
    %14 = vector.load %arg4[%c0_7, %c0_8] : memref<128x128xbf16, #tpu.memory_space<vmem>>, vector<128x128xbf16>
    %cst_9 = arith.constant dense<0.000000e+00> : vector<8x128xf32>
    %15 = tpu.matmul %13, %14, %cst_9 {dimension_numbers = #tpu.dot_dimension_numbers<[1], [0], [0], [1], [0, 0, 1, 1], [], []>} : vector<8x128xbf16>, vector<128x128xbf16>, vector<8x128xf32> -> vector<8x128xf32>
    %c0_10 = arith.constant 0 : index
    %c0_11 = arith.constant 0 : index
    %16 = vector.load %arg5[%c0_10, %c0_11] : memref<1x128xf32, #tpu.memory_space<vmem>>, vector<1x128xf32>
    %17 = vector.broadcast %16 : vector<1x128xf32> to vector<8x128xf32>
    %18 = arith.addf %15, %17 : vector<8x128xf32>
    %cst_12 = arith.constant dense<0xFF800000> : vector<8xf32>
    %19 = vector.multi_reduction <maximumf>, %18, %cst_12 [1] : vector<8x128xf32> to vector<8xf32>
    %20 = vector.shape_cast %19 : vector<8xf32> to vector<8x1xf32>
    %21 = vector.broadcast %20 : vector<8x1xf32> to vector<8x128xf32>
    %22 = arith.subf %18, %21 : vector<8x128xf32>
    %23 = math.exp %22 : vector<8x128xf32>
    %cst_13 = arith.constant dense<0.000000e+00> : vector<8xf32>
    %24 = vector.multi_reduction <add>, %23, %cst_13 [1] : vector<8x128xf32> to vector<8xf32>
    %25 = vector.shape_cast %24 : vector<8xf32> to vector<8x1xf32>
    %26 = vector.broadcast %25 : vector<8x1xf32> to vector<8x128xf32>
    %27 = arith.divf %23, %26 : vector<8x128xf32>
    %28 = vector.extract_strided_slice %27 {offsets = [0, 0], sizes = [8, 8], strides = [1, 1]} : vector<8x128xf32> to vector<8x8xf32>
    %c0_14 = arith.constant 0 : index
    %c0_15 = arith.constant 0 : index
    %29 = vector.load %arg6[%c0_14, %c0_15] : memref<8x8xf32, #tpu.memory_space<vmem>>, vector<8x8xf32>
    tpu.vector_store %arg6[%c0_14, %c0_15], %28 {strides = array<i32>} : memref<8x8xf32, #tpu.memory_space<vmem>>, vector<8x8xf32>,
    return
  }
  func.func @transform_0(%arg0: i32) -> (i32, i32) {
    %c0_i32 = arith.constant 0 : i32
    %c0_i32_0 = arith.constant 0 : i32
    return %arg0, %c0_i32 : i32, i32
  }
  func.func @transform_1(%arg0: i32) -> (i32, i32) {
    %c0_i32 = arith.constant 0 : i32
    %c0_i32_0 = arith.constant 0 : i32
    %c0_i32_1 = arith.constant 0 : i32
    return %c0_i32, %c0_i32_0 : i32, i32
  }
  func.func @transform_2(%arg0: i32) -> (i32, i32) {
    %c0_i32 = arith.constant 0 : i32
    %c0_i32_0 = arith.constant 0 : i32
    %c0_i32_1 = arith.constant 0 : i32
    return %c0_i32, %c0_i32_0 : i32, i32
  }
  func.func @transform_3(%arg0: i32) -> (i32, i32) {
    %c0_i32 = arith.constant 0 : i32
    %c0_i32_0 = arith.constant 0 : i32
    %c0_i32_1 = arith.constant 0 : i32
    return %c0_i32, %c0_i32_0 : i32, i32
  }
  func.func @transform_4(%arg0: i32) -> (i32, i32) {
    %c0_i32 = arith.constant 0 : i32
    %c0_i32_0 = arith.constant 0 : i32
    %c0_i32_1 = arith.constant 0 : i32
    return %c0_i32, %c0_i32_0 : i32, i32
  }
  func.func @transform_5(%arg0: i32) -> (i32, i32) {
    %c0_i32 = arith.constant 0 : i32
    %c0_i32_0 = arith.constant 0 : i32
    return %arg0, %c0_i32 : i32, i32
  }
}

</mosaic_0001>

<bundles_post_ra>
// kernel: softmax_model_forward.1
= control target key start
LH: loop header
LB: loop body
LE: loop exit
PB: predicated region body
PF: predicated region fallthrough
CT: control target
= control target key end

     0   :  { %10 = vsyncpa [#allocation3], 0  ;;  %s545_s0 = inlined_call_operand.hbm [shape: f32[8,32], index: 0, kind: input, shape index: {}]   ;;  %s546_s1 = inlined_call_operand.hbm [shape: bf16[32,128], index: 1, kind: input, shape index: {}]   ;;  %s547_s2 = inlined_call_operand.vmem [shape: f32[1,128], index: 2, kind: input, shape index: {}]   ;;  %s548_s3 = inlined_call_operand.hbm [shape: bf16[128,128], index: 3, kind: input, shape index: {}]   ;;  %s549_s4 = inlined_call_operand.vmem [shape: f32[1,128], index: 4, kind: input, shape index: {}]   ;;  %s550_s5 = inlined_call_operand.hbm [shape: f32[8,8], index: 5, kind: output, shape index: {}]  }
   0x1   :  { %11 = vsyncpa [#allocation6], 0 }
   0x2   :  { %12 = vsyncpa [#allocation4], 0  ;;  %s447_s18 = smov [#allocation5]   ;;  %s353_s22 = scalar_lea.hbm %s546_s1, 256 }
   0x3   :  { %s28_s19 = sshll.u32 %s447_s18, 4  ;;  %p354_p0 = scmp.ne.s32.totalorder %s546_s1, %s353_s22  ;;  %s29_s19 = int_to_ptr.vmem [resolvable:$true] %s28_s19 }
   0x4   :  { %p357_p1 = scmp.lt.u32.totalorder %s353_s22, %s546_s1 }
   0x6   :  { %p359_p2 = pnand %p357_p1, %p354_p0 }
   0x8   :  { %362 = shalt.err (!%p359_p2)
}
   0x9   :  { %s363_s27 = scalar_lea.vmem %s29_s19, 256  ;;  %p368_p4 = scmp.lt.s32.totalorder %s29_s19, %s29_s19 }
   0xa   :  { %p364_p3 = scmp.ne.s32.totalorder %s29_s19, %s363_s27  ;;  %p369_p5 = scmp.lt.s32.totalorder %s363_s27, %s363_s27 }
   0xc   :  { %p370_p6 = por %p369_p5, %p368_p4 }
   0xe   :  { %p371_p7 = pnand %p370_p6, %p364_p3 }
  0x10   :  { %374 = shalt.err (!%p371_p7)
}
  0x11   :  { %s448_s28 = smov 64   ;;  %s449_s29 = smov 4  }
  0x12   :  { %34 = dma.hbm_to_vmem [thread:$0]  %s546_s1, 256, %s29_s19, [#allocation6], %s448_s28, %s448_s28, %s449_s29  }
  0x13   :  { %s450_s7 = smov [#allocation2]   ;;  %s451_s9 = smov [#allocation7]  }
  0x14   :  { %s19_s8 = sshll.u32 %s450_s7, 4  ;;  %s42_s10 = sshll.u32 %s451_s9, 4  ;;  %s20_s8 = int_to_ptr.vmem [resolvable:$true] %s19_s8  ;;  %s43_s10 = int_to_ptr.vmem [resolvable:$true] %s42_s10 }
  0x15   :  { %s375_s13 = scalar_lea.hbm %s545_s0, 128 }
  0x16   :  { %p376_p8 = scmp.ne.s32.totalorder %s545_s0, %s375_s13  ;;  %p379_p9 = scmp.lt.u32.totalorder %s375_s13, %s545_s0 }
  0x18   :  { %p381_p10 = pnand %p379_p9, %p376_p8 }
  0x1a   :  { %384 = shalt.err (!%p381_p10)
}
  0x1b   :  { %s385_s1 = scalar_lea.vmem %s20_s8, 128  ;;  %p390_p12 = scmp.lt.s32.totalorder %s20_s8, %s20_s8 }
  0x1c   :  { %p386_p11 = scmp.ne.s32.totalorder %s20_s8, %s385_s1  ;;  %p391_p13 = scmp.lt.s32.totalorder %s385_s1, %s385_s1 }
  0x1e   :  { %p392_p0 = por %p391_p13, %p390_p12 }
  0x20   :  { %p393_p1 = pnand %p392_p0, %p386_p11 }
  0x22   :  { %396 = shalt.err (!%p393_p1)
}
  0x23   :  { %22 = dma.hbm_to_vmem [thread:$0]  %s545_s0, 128, %s20_s8, [#allocation3]  }
  0x24   :  { %s397_s22 = scalar_lea.hbm %s548_s3, 1024 }
  0x25   :  { %p398_p2 = scmp.ne.s32.totalorder %s548_s3, %s397_s22  ;;  %p401_p3 = scmp.lt.u32.totalorder %s397_s22, %s548_s3 }
  0x27   :  { %p403_p4 = pnand %p401_p3, %p398_p2 }
  0x29   :  { %406 = shalt.err (!%p403_p4)
}
  0x2a   :  { %s407_s27 = scalar_lea.vmem %s43_s10, 1024  ;;  %p412_p6 = scmp.lt.s32.totalorder %s43_s10, %s43_s10 }
  0x2b   :  { %p408_p5 = scmp.ne.s32.totalorder %s43_s10, %s407_s27  ;;  %p413_p7 = scmp.lt.s32.totalorder %s407_s27, %s407_s27 }
  0x2d   :  { %p414_p8 = por %p413_p7, %p412_p6 }
  0x2f   :  { %p415_p9 = pnand %p414_p8, %p408_p5 }
  0x31   :  { %418 = shalt.err (!%p415_p9)
}
  0x32   :  { %48 = dma.hbm_to_vmem [thread:$0]  %s548_s3, 1024, %s43_s10, [#allocation6], %s448_s28, %s448_s28, %s449_s29  }
  0x33   :  { %441 = dma.done.wait [#allocation3], 128  }
  0x34   :  { %442 = vsyncadd [#allocation3], 4294967168 }
  0x35   :  { %443 = dma.done.wait [#allocation6], 1280  }
  0x36   :  { %444 = vsyncadd [#allocation6], 4294966016  ;;  %v452_v0 = vmov 0.0   ;;  %vm453_vm0 = vmmov 0   ;;  %v335_v1 = vld [vmem:[#allocation5] sm:$0xff]   ;;  %v336_v2 = vld [vmem:[#allocation5 + $0x8] sm:$0xff]  }
  0x37   :  { %299 = vmatprep.subr.bf16.mxu0 %v452_v0  ;;  %303 = vmatprep.mubr.msk.bf16.mxu0 %vm453_vm0, %v452_v0  ;;  %v61_v3 = vld [vmem:[#allocation2] sm:$0xff]  ;;  %vm86_vm1 = vcmask 261120   ;;  %v337_v5 = vld [vmem:[#allocation7] sm:$0xff]   ;;  %v339_v7 = vld [vmem:[#allocation7 + $0x10] sm:$0xff]   ;;  %vm256_vm2 = vcmask 64512  }
  0x38   :  { %307 = vmatprep.subr.bf16.mxu1 %v452_v0  ;;  %323 = vmatprep.mubr.msk.bf16.mxu1 %vm453_vm0, %v452_v0  ;;  %v62_v4 = vpack.c.bf16 %v61_v3, %v61_v3  ;;  %v338_v6 = vld [vmem:[#allocation7 + $0x8] sm:$0xff]   ;;  %v340_v8 = vld [vmem:[#allocation7 + $0x18] sm:$0xff]   ;;  %v341_v9 = vld [vmem:[#allocation7 + $0x20] sm:$0xff]  }
  0x39   :  { %300 = vmatpush3.bf16.msra.mxu0 %v335_v1  ;;  %308 = vmatpush3.bf16.msra.mxu1 %v337_v5  ;;  %v342_v10 = vld [vmem:[#allocation7 + $0x28] sm:$0xff]   ;;  %v343_v11 = vld [vmem:[#allocation7 + $0x30] sm:$0xff]   ;;  %v344_v12 = vld [vmem:[#allocation7 + $0x38] sm:$0xff]  }
  0x3a   :  { %301 = vmatprep.subr.bf16.mxu0 %v452_v0  ;;  %309 = vmatprep.subr.bf16.mxu1 %v452_v0  ;;  %v274_v13 = vld [vmem:[%s547_s2] ss:$0 sm:$0xff]  ;;  %s454_s2 = smov [#allocation8]  }
  0x3b   :  { %v278_v25 = vld [vmem:[%s549_s4] ss:$0 sm:$0xff]  ;;  %s264_s7 = sshll.u32 %s454_s2, 4  ;;  %s265_s7 = int_to_ptr.vmem [resolvable:$true] %s264_s7 }
  0x3c   :  { %s419_s4 = scalar_lea.vmem %s265_s7, 128  ;;  %p424_p11 = scmp.lt.s32.totalorder %s265_s7, %s265_s7 }
  0x3d   :  { %302 = vmatpush3.bf16.msra.mxu0 %v336_v2  ;;  %310 = vmatpush3.bf16.msra.mxu1 %v338_v6  ;;  %p420_p10 = scmp.ne.s32.totalorder %s265_s7, %s419_s4  ;;  %p425_p12 = scmp.lt.s32.totalorder %s419_s4, %s419_s4 }
  0x3e   :  { %311 = vmatprep.subr.bf16.mxu1 %v452_v0 }
  0x3f   :  { %p426_p13 = por %p425_p12, %p424_p11 }
  0x40   :  { %304 = vmatmul.mubr.msk.bf16.vlgmr.msra.gmra.mrb[0].mxu0 %vm86_vm1, %v62_v4 }
  0x41   :  { %312 = vmatpush3.bf16.msra.mxu1 %v339_v7  ;;  %p427_p0 = pnand %p426_p13, %p420_p10 }
  0x42   :  { %313 = vmatprep.subr.bf16.mxu1 %v452_v0 }
  0x45   :  { %314 = vmatpush3.bf16.msra.mxu1 %v340_v8 }
  0x46   :  { %315 = vmatprep.subr.bf16.mxu1 %v452_v0 }
  0x49   :  { %316 = vmatpush3.bf16.msra.mxu1 %v341_v9 }
  0x4a   :  { %317 = vmatprep.subr.bf16.mxu1 %v452_v0 }
  0x4d   :  { %318 = vmatpush3.bf16.msra.mxu1 %v342_v10 }
  0x4e   :  { %319 = vmatprep.subr.bf16.mxu1 %v452_v0 }
  0x51   :  { %320 = vmatpush3.bf16.msra.mxu1 %v343_v11 }
  0x52   :  { %321 = vmatprep.subr.bf16.mxu1 %v452_v0 }
  0x55   :  { %322 = vmatpush3.bf16.msra.mxu1 %v344_v12 }
 0x113   :  { %v124_v14 = vpop.f32.mrb[0].mxu0 }
 0x114   :  { %v125_v15 = vadd.f32 %v274_v13, %v124_v14  ;;  %v305_v16 = vpop.f32.mrb[1].mxu0 }
 0x115   :  { %v127_v17 = vpop.f32.mrb[2].mxu0 }
 0x116   :  { %v130_v18 = vsub.f32 0.0, %v125_v15  ;;  %v306_v19 = vpop.f32.mrb[3].mxu0 }
 0x118   :  { %v131_v20 = vmul.f32 1.442695, %v130_v18 }
 0x11a   :  { %345 = vpow2.f32 %v131_v20 }
 0x124   :  { %v346_v21 = vpop.eup %345 }
 0x125   :  { %v133_v22 = vadd.f32 1.0, %v346_v21 }
 0x127   :  { %347 = vrcp.f32 %v133_v22 }
 0x131   :  { %v348_v23 = vpop.eup %347 }
 0x132   :  { %v135_v24 = vpack.c.bf16 %v348_v23, %v348_v23 }
 0x134   :  { %324 = vmatmul.mubr.bf16.vlgmr.msra.gmra.mrb[0].mxu1 %v135_v24 }
 0x207   :  { %v241_v26 = vpop.f32.mrb[0].mxu1 }
 0x208   :  { %v242_v27 = vadd.f32 %v278_v25, %v241_v26  ;;  %v325_v28 = vpop.f32.mrb[1].mxu1 }
 0x209   :  { %v244_v29 = vpop.f32.mrb[2].mxu1 }
 0x20a   :  { %247 = vmax.xlane.f32.xlu0 %v242_v27  ;;  %v326_v30 = vpop.f32.mrb[3].mxu1 }
 0x297   :  { %v248_v31 = vpop.xlane.xlu0 %247 }
 0x298   :  { %v249_v32 = vsub.f32 %v242_v27, %v248_v31 }
 0x29a   :  { %v250_v33 = vmul.f32 1.442695, %v249_v32 }
 0x29c   :  { %349 = vpow2.f32 %v250_v33 }
 0x2a6   :  { %v350_v34 = vpop.eup %349 }
 0x2a7   :  { %252 = vadd.xlane.f32.xlu0 %v350_v34 }
 0x334   :  { %v253_v35 = vpop.xlane.xlu0 %252 }
 0x335   :  { %351 = vrcp.f32 %v253_v35 }
 0x33f   :  { %v352_v36 = vpop.eup %351 }
 0x340   :  { %v255_v37 = vmul.f32 %v352_v36, %v350_v34 }
 0x342   :  { %257 = vst.msk [vmem:[#allocation8] sm:$0xff] %vm256_vm2, %v255_v37 }
 0x343   :  { %430 = shalt.err (!%p427_p0)
}
 0x344   :  { %s431_s10 = scalar_lea.hbm %s550_s5, 128 }
 0x345   :  { %p432_p1 = scmp.ne.s32.totalorder %s550_s5, %s431_s10  ;;  %p435_p2 = scmp.lt.u32.totalorder %s431_s10, %s550_s5 }
 0x347   :  { %p437_p3 = pnand %p435_p2, %p432_p1 }
 0x349   :  { %440 = shalt.err (!%p437_p3)
}
 0x34a   :  { %267 = dma.vmem_to_hbm [thread:$0]  %s265_s7, 128, %s550_s5, [#allocation4]  }
 0x34b   :  { %445 = dma.done.wait [#allocation4], 128  }
 0x34c   :  { %446 = vsyncadd [#allocation4], 4294967168 }
 0x34d   :  { %271 = vsyncpa [#allocation3], 1 }
 0x34e   :  { %272 = vsyncpa [#allocation6], 1 }
 0x34f   :  { %273 = vsyncpa [#allocation4], 1 }

</bundles_post_ra>
